<compile_context>
chip_gen: v7x
topology: tpu7x:2x2x1
jax: 0.10.0
libtpu: 0.0.40
codegen_flags: <defaults>
</compile_context>

<pallas_src>
import jax
import jax.numpy as jnp
from jax.experimental import pallas as pl
from jax.experimental.pallas import tpu as pltpu

# Fixed module dimensions (nn.Linear(2,2), nn.Linear(2,4,bias=False)).
D_IN = 2
D_HID = 2
D_OUT = 4

K_PAD = 8          # padded contraction dim (real K = D_IN = 2, +1 bias row)
N_SUB = 8          # padded output-feature dim on the sublane axis (real N = 4)
BIAS_ROW = D_IN    # contraction row that carries the folded bias (x row == 1.0)

LANE = 128         # lane alignment for the M axis
TM_MAX = 16384     # max lanes per grid step (~512 KiB per f32 buffer)


def fused_mlp_kernel(w_ref, x_ref, o_ref):
    # w_ref: (N_SUB, K_PAD)  fused weight [W_comb^T | b_comb | 0...], resident
    # x_ref: (K_PAD, TM)     channels-first activations, row BIAS_ROW == 1.0
    # o_ref: (N_SUB, TM)     relu(W x + b), lane-dense along M
    y = jnp.dot(w_ref[...], x_ref[...], preferred_element_type=jnp.float32)
    o_ref[...] = jnp.maximum(y, 0.0).astype(o_ref.dtype)


def prepare_params(w1, b1, w2):
    """Fuse the two linears, fold the bias, pad once (parameter-setup time)."""
    assert w1.shape == (D_HID, D_IN) and b1.shape == (D_HID,) and w2.shape == (D_OUT, D_HID)
    w_comb = w1.T @ w2.T                        # (D_IN, D_OUT): y = x @ w_comb + b_comb
    b_comb = w2 @ b1                            # (D_OUT,)
    w_p = jnp.zeros((N_SUB, K_PAD), jnp.float32)
    w_p = w_p.at[:D_OUT, :D_IN].set(w_comb.T.astype(jnp.float32))
    w_p = w_p.at[:D_OUT, BIAS_ROW].set(b_comb.astype(jnp.float32))
    return w_p


def _round_up(a, b):
    return ((a + b - 1) // b) * b


def model_forward(x1, w_p):
    """x1: (B, C=2, T) float32. Returns relu((x1^T W1^T + b1) W2^T): (B, T, 4)."""
    B, C, T = x1.shape
    M = B * T

    # Lane tiling along M: single tile for small problems, TM_MAX tiles
    # (>= 2 grid steps, sharded across TensorCores) for large ones.
    m_aligned = _round_up(M, LANE)
    if m_aligned <= TM_MAX:
        TM = m_aligned
        M_PAD = TM
    else:
        TM = TM_MAX
        M_PAD = _round_up(M, TM)

    # Channels-first view: (B, C, T) -> (C, B, T) -> (C, M).  Last dim stays
    # last, so this is a cheap leading-axis transpose, not a lane/sublane swap.
    xT = jnp.transpose(x1, (1, 0, 2)).reshape(C, M).astype(jnp.float32)

    # Pad contraction rows: [x ; ones (bias row) ; zeros], then pad M to M_PAD.
    x_stack = jnp.concatenate(
        [xT,
         jnp.ones((1, M), jnp.float32),                  # bias row
         jnp.zeros((K_PAD - C - 1, M), jnp.float32)],
        axis=0)                                          # (K_PAD, M)
    x_p = jnp.pad(x_stack, ((0, 0), (0, M_PAD - M)))     # (K_PAD, M_PAD)

    out_p = pl.pallas_call(
        fused_mlp_kernel,
        out_shape=jax.ShapeDtypeStruct((N_SUB, M_PAD), jnp.float32),
        grid=(M_PAD // TM,),
        in_specs=[
            pl.BlockSpec((N_SUB, K_PAD), lambda i: (0, 0)),   # resident weight
            pl.BlockSpec((K_PAD, TM), lambda i: (0, i)),
        ],
        out_specs=pl.BlockSpec((N_SUB, TM), lambda i: (0, i)),
        compiler_params=pltpu.CompilerParams(
            dimension_semantics=("parallel",)),
    )(w_p, x_p)

    # (4, M) -> (M, 4) -> (B, T, 4).  Fuses with the consumer under jit;
    # only 16 useful bytes/row are read back from the padded buffer.
    return out_p[:D_OUT, :M].T.reshape(B, T, D_OUT)


def reference_forward(x1, w1, b1, w2):
    v1 = jnp.transpose(x1, (0, 2, 1))
    v2 = v1 @ w1.T + b1
    v3 = v2 @ w2.T
    return jnp.maximum(v3, 0.0)


if __name__ == "__main__":
    key = jax.random.PRNGKey(0)
    kx, kw1, kb1, kw2 = jax.random.split(key, 4)

    # Input matches torch.randn(1, 2, 2): (B=1, C=2, T=2)
    x1 = jax.random.normal(kx, (1, 2, 2), dtype=jnp.float32)

    # Deterministic parameter init (shapes from nn.Linear(2,2), nn.Linear(2,4, bias=False)).
    w1 = jax.random.uniform(kw1, (2, 2), jnp.float32, -0.5, 0.5)
    b1 = jax.random.uniform(kb1, (2,), jnp.float32, -0.5, 0.5)
    w2 = jax.random.uniform(kw2, (4, 2), jnp.float32, -0.5, 0.5)

    # Fuse + pad weights once (outside the per-call path).
    w_p = jax.block_until_ready(prepare_params(w1, b1, w2))

    fwd = jax.jit(model_forward)
    out = jax.block_until_ready(fwd(x1, w_p))

    ref = reference_forward(x1, w1, b1, w2)
    assert out.shape == (1, 2, 4), out.shape
    assert jnp.allclose(out, ref, atol=1e-5, rtol=1e-5), (out, ref)

    print("KERNEL_OK")
</pallas_src>

<mosaic_0001>
module attributes {stable_mosaic.version = 11 : i64} {
  func.func @fused_mlp_kernel(%arg0: i32, %arg1: memref<8x8xf32, #tpu.memory_space<vmem>>, %arg2: memref<8x128xf32, #tpu.memory_space<vmem>>, %arg3: memref<8x128xf32, #tpu.memory_space<vmem>>) attributes {dimension_semantics = [#tpu.dimension_semantics<parallel>], iteration_bounds = array<i64: 1>, scalar_prefetch = 0 : i64, scratch_operands = 0 : i64, tpu.core_type = #tpu.core_type<tc>, window_params = [{pipeline_mode = #tpu.pipeline_mode<synchronous>, transform_indices = @transform_0, window_bounds = array<i64: 8, 8>}, {transform_indices = @transform_1, window_bounds = array<i64: 8, 128>}, {transform_indices = @transform_2, window_bounds = array<i64: 8, 128>}]} {
    %c0 = arith.constant 0 : index
    %c0_0 = arith.constant 0 : index
    %0 = vector.load %arg1[%c0, %c0_0] : memref<8x8xf32, #tpu.memory_space<vmem>>, vector<8x8xf32>
    %c0_1 = arith.constant 0 : index
    %c0_2 = arith.constant 0 : index
    %1 = vector.load %arg2[%c0_1, %c0_2] : memref<8x128xf32, #tpu.memory_space<vmem>>, vector<8x128xf32>
    %cst = arith.constant dense<0.000000e+00> : vector<8x128xf32>
    %2 = tpu.matmul %0, %1, %cst {dimension_numbers = #tpu.dot_dimension_numbers<[1], [0], [0], [1], [0, 0, 1, 1], [], []>} : vector<8x8xf32>, vector<8x128xf32>, vector<8x128xf32> -> vector<8x128xf32>
    %cst_3 = arith.constant 0.000000e+00 : f32
    %3 = vector.broadcast %cst_3 : f32 to vector<8x128xf32>
    %4 = arith.maximumf %2, %3 : vector<8x128xf32>
    %c0_4 = arith.constant 0 : index
    %c0_5 = arith.constant 0 : index
    %5 = vector.load %arg3[%c0_4, %c0_5] : memref<8x128xf32, #tpu.memory_space<vmem>>, vector<8x128xf32>
    tpu.vector_store %arg3[%c0_4, %c0_5], %4 {strides = array<i32>} : memref<8x128xf32, #tpu.memory_space<vmem>>, vector<8x128xf32>,
    return
  }
  func.func @transform_0(%arg0: i32) -> (i32, i32) {
    %c0_i32 = arith.constant 0 : i32
    %c0_i32_0 = arith.constant 0 : i32
    %c0_i32_1 = arith.constant 0 : i32
    return %c0_i32, %c0_i32_0 : i32, i32
  }
  func.func @transform_1(%arg0: i32) -> (i32, i32) {
    %c0_i32 = arith.constant 0 : i32
    %c0_i32_0 = arith.constant 0 : i32
    return %c0_i32, %arg0 : i32, i32
  }
  func.func @transform_2(%arg0: i32) -> (i32, i32) {
    %c0_i32 = arith.constant 0 : i32
    %c0_i32_0 = arith.constant 0 : i32
    return %c0_i32, %arg0 : i32, i32
  }
}

</mosaic_0001>

<bundles_post_ra>
// kernel: model_forward.1
= control target key start
LH: loop header
LB: loop body
LE: loop exit
PB: predicated region body
PF: predicated region fallthrough
CT: control target
= control target key end

     0   :  { %vm13_vm0 = vcmask 64512   ;;  %v103_v0 = vmov 0.0   ;;  %vm104_vm1 = vmmov 0   ;;  %s129_s1 = inlined_call_operand.vmem [shape: f32[8,128], index: 1, kind: input, shape index: {}]   ;;  %s130_s0 = inlined_call_operand.vmem [shape: f32[8,8], index: 0, kind: input, shape index: {}]   ;;  %s131_s2 = inlined_call_operand.vmem [shape: f32[8,128], index: 2, kind: output, shape index: {}]  }
   0x1   :  { %96 = vmatprep.subr.mxu0 %v103_v0  ;;  %v12_v1 = vld [vmem:[%s129_s1] sm:$0xff]  ;;  %98 = vmatprep.mubr.msk.f32.mxu0 %vm104_vm1, %v103_v0 }
   0x2   :  { %v11_v2 = vld [vmem:[%s130_s0] sm:$0xff]  ;;  %97 = vmatpush3.msra.mxu0 %v12_v1 }
   0x3   :  { %99 = vmatmul.mubr.msk.f32.vlgmr.msra.gmra.mrb[0].mxu0 %vm13_vm0, %v11_v2 }
  0xd6   :  { %v83_v3 = vpop.f32.mrb[0].mxu0 }
  0xd7   :  { %v87_v4 = vmax.f32 %v83_v3, 0.0  ;;  %v100_v5 = vpop.f32.mrb[1].mxu0 }
  0xd9   :  { %88 = vst [vmem:[%s131_s2] sm:$0xff] %v87_v4 }

</bundles_post_ra>
